<compile_context>
chip_gen: v6e
topology: v6e:2x2x1
jax: 0.10.0
libtpu: 0.0.40
codegen_flags: <defaults>
</compile_context>

<pallas_src>
import jax
import jax.numpy as jnp
from jax.experimental import pallas as pl
from jax.experimental.pallas import tpu as pltpu

EPS = 1e-5

# Row layout of the packed small-vector operand (each row is 128 lanes).
_ROW_G1 = 0   # gamma1 (128)
_ROW_BE1 = 1  # beta1  (128)
_ROW_G2 = 2   # gamma2 (64, zero-padded to 128)
_ROW_BE2 = 3  # beta2  (64, zero-padded to 128)
_ROW_B3 = 4   # output bias (2, zero-padded to 128)


def _mlp_bn_kernel(x_ref, w1_ref, w2_ref, w3_ref, vecs_ref, o_ref):
    x = x_ref[...]                       # (B, D)
    vecs = vecs_ref[...]                 # (5, 128)

    g1 = vecs[_ROW_G1:_ROW_G1 + 1, :]          # (1, 128)
    be1 = vecs[_ROW_BE1:_ROW_BE1 + 1, :]       # (1, 128)
    g2 = vecs[_ROW_G2:_ROW_G2 + 1, :64]        # (1, 64)
    be2 = vecs[_ROW_BE2:_ROW_BE2 + 1, :64]     # (1, 64)
    b3 = vecs[_ROW_B3:_ROW_B3 + 1, :]          # (1, 128)

    # ---- layer1 + BN(128) + ReLU ---------------------------------------
    # Linear bias omitted: it is exactly cancelled by the BN mean subtraction.
    h = jnp.dot(x, w1_ref[...], preferred_element_type=jnp.float32)   # (B, 128)
    mu = jnp.mean(h, axis=0, keepdims=True)
    var = jnp.mean((h - mu) * (h - mu), axis=0, keepdims=True)         # biased var
    s = g1 * jax.lax.rsqrt(var + EPS)      # folded BN scale
    t = be1 - mu * s                       # folded BN shift
    h = jnp.maximum(h * s + t, 0.0)

    # ---- layer2 + BN(64) + ReLU ----------------------------------------
    h = jnp.dot(h, w2_ref[...], preferred_element_type=jnp.float32)    # (B, 64)
    mu = jnp.mean(h, axis=0, keepdims=True)
    var = jnp.mean((h - mu) * (h - mu), axis=0, keepdims=True)
    s = g2 * jax.lax.rsqrt(var + EPS)
    t = be2 - mu * s
    h = jnp.maximum(h * s + t, 0.0)

    # ---- output layer (lane-dense, padded to 128 columns) ---------------
    o_ref[...] = (jnp.dot(h, w3_ref[...], preferred_element_type=jnp.float32)
                  + b3)


def neural_network_forward(x, params):
    """x: (B, D) float32. params: dict of weights in (in, out) layout."""
    B = x.shape[0]

    # Pad the output projection to 128 lanes (zeros contribute nothing).
    w3p = jnp.zeros((64, 128), jnp.float32).at[:, :2].set(params["w3"])

    # Pack all small per-layer vectors into one (5, 128) operand.
    vecs = jnp.zeros((5, 128), jnp.float32)
    vecs = vecs.at[_ROW_G1, :].set(params["g1"][0])
    vecs = vecs.at[_ROW_BE1, :].set(params["be1"][0])
    vecs = vecs.at[_ROW_G2, :64].set(params["g2"][0])
    vecs = vecs.at[_ROW_BE2, :64].set(params["be2"][0])
    vecs = vecs.at[_ROW_B3, :2].set(params["b3"][0])

    args = (x, params["w1"], params["w2"], w3p, vecs)
    in_specs = [pl.BlockSpec(memory_space=pltpu.MemorySpace.VMEM)] * len(args)
    out_spec = pl.BlockSpec(memory_space=pltpu.MemorySpace.VMEM)

    out_padded = pl.pallas_call(
        _mlp_bn_kernel,
        out_shape=jax.ShapeDtypeStruct((B, 128), jnp.float32),
        in_specs=in_specs,
        out_specs=out_spec,
    )(*args)
    return out_padded[:, :2]


def init_params(key, d_in):
    """Deterministic synthetic init (shapes match the torch module)."""
    ks = jax.random.split(key, 6)

    def lin(kw, kb, fan_in, fan_out):
        bound = 1.0 / jnp.sqrt(fan_in)
        w = jax.random.uniform(kw, (fan_in, fan_out), jnp.float32, -bound, bound)
        b = jax.random.uniform(kb, (1, fan_out), jnp.float32, -bound, bound)
        return w, b

    w1, b1 = lin(ks[0], ks[1], d_in, 128)
    w2, b2 = lin(ks[2], ks[3], 128, 64)
    w3, b3 = lin(ks[4], ks[5], 64, 2)
    return {
        "w1": w1, "b1": b1,
        "g1": jnp.ones((1, 128), jnp.float32), "be1": jnp.zeros((1, 128), jnp.float32),
        "w2": w2, "b2": b2,
        "g2": jnp.ones((1, 64), jnp.float32), "be2": jnp.zeros((1, 64), jnp.float32),
        "w3": w3, "b3": b3,
    }


def _reference(x, p):
    """Pure-JAX reference of the same forward (training-mode BN), biases included."""
    h = x @ p["w1"] + p["b1"]
    mu = h.mean(0, keepdims=True)
    var = ((h - mu) ** 2).mean(0, keepdims=True)
    h = jnp.maximum((h - mu) / jnp.sqrt(var + EPS) * p["g1"] + p["be1"], 0.0)
    h = h @ p["w2"] + p["b2"]
    mu = h.mean(0, keepdims=True)
    var = ((h - mu) ** 2).mean(0, keepdims=True)
    h = jnp.maximum((h - mu) / jnp.sqrt(var + EPS) * p["g2"] + p["be2"], 0.0)
    return h @ p["w3"] + p["b3"]


if __name__ == "__main__":
    B, D = 8, 32  # small batch, X_train.shape[1] = 32
    key = jax.random.PRNGKey(0)
    kx, kp = jax.random.split(key)
    x = jax.random.normal(kx, (B, D), jnp.float32)
    params = init_params(kp, D)

    out = neural_network_forward(x, params)
    out = jax.block_until_ready(out)

    ref = _reference(x, params)
    assert out.shape == (B, 2)
    assert jnp.allclose(out, ref, atol=1e-4, rtol=1e-4), "mismatch vs reference"
    print("KERNEL_OK")
</pallas_src>

<mosaic_0001>
module attributes {stable_mosaic.version = 11 : i64} {
  func.func @_mlp_bn_kernel(%arg0: memref<8x32xf32, #tpu.memory_space<vmem>>, %arg1: memref<32x128xf32, #tpu.memory_space<vmem>>, %arg2: memref<128x64xf32, #tpu.memory_space<vmem>>, %arg3: memref<64x128xf32, #tpu.memory_space<vmem>>, %arg4: memref<5x128xf32, #tpu.memory_space<vmem>>, %arg5: memref<8x128xf32, #tpu.memory_space<vmem>>) attributes {dimension_semantics = [], scalar_prefetch = 0 : i64, scratch_operands = 0 : i64, tpu.core_type = #tpu.core_type<tc>} {
    %c0 = arith.constant 0 : index
    %c0_0 = arith.constant 0 : index
    %0 = vector.load %arg0[%c0, %c0_0] : memref<8x32xf32, #tpu.memory_space<vmem>>, vector<8x32xf32>
    %c0_1 = arith.constant 0 : index
    %c0_2 = arith.constant 0 : index
    %1 = vector.load %arg4[%c0_1, %c0_2] : memref<5x128xf32, #tpu.memory_space<vmem>>, vector<5x128xf32>
    %2 = vector.extract_strided_slice %1 {offsets = [0, 0], sizes = [1, 128], strides = [1, 1]} : vector<5x128xf32> to vector<1x128xf32>
    %3 = vector.extract_strided_slice %1 {offsets = [1, 0], sizes = [1, 128], strides = [1, 1]} : vector<5x128xf32> to vector<1x128xf32>
    %4 = vector.extract_strided_slice %1 {offsets = [2, 0], sizes = [1, 64], strides = [1, 1]} : vector<5x128xf32> to vector<1x64xf32>
    %5 = vector.extract_strided_slice %1 {offsets = [3, 0], sizes = [1, 64], strides = [1, 1]} : vector<5x128xf32> to vector<1x64xf32>
    %6 = vector.extract_strided_slice %1 {offsets = [4, 0], sizes = [1, 128], strides = [1, 1]} : vector<5x128xf32> to vector<1x128xf32>
    %c0_3 = arith.constant 0 : index
    %c0_4 = arith.constant 0 : index
    %7 = vector.load %arg1[%c0_3, %c0_4] : memref<32x128xf32, #tpu.memory_space<vmem>>, vector<32x128xf32>
    %cst = arith.constant dense<0.000000e+00> : vector<8x128xf32>
    %8 = tpu.matmul %0, %7, %cst {dimension_numbers = #tpu.dot_dimension_numbers<[1], [0], [0], [1], [0, 0, 1, 1], [], []>} : vector<8x32xf32>, vector<32x128xf32>, vector<8x128xf32> -> vector<8x128xf32>
    %cst_5 = arith.constant dense<0.000000e+00> : vector<128xf32>
    %9 = vector.multi_reduction <add>, %8, %cst_5 [0] : vector<8x128xf32> to vector<128xf32>
    %10 = vector.shape_cast %9 : vector<128xf32> to vector<1x128xf32>
    %cst_6 = arith.constant 8.000000e+00 : f32
    %11 = vector.broadcast %cst_6 : f32 to vector<1x128xf32>
    %12 = arith.divf %10, %11 : vector<1x128xf32>
    %13 = vector.broadcast %12 : vector<1x128xf32> to vector<8x128xf32>
    %14 = arith.subf %8, %13 : vector<8x128xf32>
    %15 = vector.broadcast %12 : vector<1x128xf32> to vector<8x128xf32>
    %16 = arith.subf %8, %15 : vector<8x128xf32>
    %17 = arith.mulf %14, %16 : vector<8x128xf32>
    %cst_7 = arith.constant dense<0.000000e+00> : vector<128xf32>
    %18 = vector.multi_reduction <add>, %17, %cst_7 [0] : vector<8x128xf32> to vector<128xf32>
    %19 = vector.shape_cast %18 : vector<128xf32> to vector<1x128xf32>
    %cst_8 = arith.constant 8.000000e+00 : f32
    %20 = vector.broadcast %cst_8 : f32 to vector<1x128xf32>
    %21 = arith.divf %19, %20 : vector<1x128xf32>
    %cst_9 = arith.constant 9.99999974E-6 : f32
    %22 = vector.broadcast %cst_9 : f32 to vector<1x128xf32>
    %23 = arith.addf %21, %22 : vector<1x128xf32>
    %24 = math.rsqrt %23 : vector<1x128xf32>
    %25 = arith.mulf %2, %24 : vector<1x128xf32>
    %26 = arith.mulf %12, %25 : vector<1x128xf32>
    %27 = arith.subf %3, %26 : vector<1x128xf32>
    %28 = vector.broadcast %25 : vector<1x128xf32> to vector<8x128xf32>
    %29 = arith.mulf %8, %28 : vector<8x128xf32>
    %30 = vector.broadcast %27 : vector<1x128xf32> to vector<8x128xf32>
    %31 = arith.addf %29, %30 : vector<8x128xf32>
    %cst_10 = arith.constant 0.000000e+00 : f32
    %32 = vector.broadcast %cst_10 : f32 to vector<8x128xf32>
    %33 = arith.maximumf %31, %32 : vector<8x128xf32>
    %c0_11 = arith.constant 0 : index
    %c0_12 = arith.constant 0 : index
    %34 = vector.load %arg2[%c0_11, %c0_12] : memref<128x64xf32, #tpu.memory_space<vmem>>, vector<128x64xf32>
    %cst_13 = arith.constant dense<0.000000e+00> : vector<8x64xf32>
    %35 = tpu.matmul %33, %34, %cst_13 {dimension_numbers = #tpu.dot_dimension_numbers<[1], [0], [0], [1], [0, 0, 1, 1], [], []>} : vector<8x128xf32>, vector<128x64xf32>, vector<8x64xf32> -> vector<8x64xf32>
    %cst_14 = arith.constant dense<0.000000e+00> : vector<64xf32>
    %36 = vector.multi_reduction <add>, %35, %cst_14 [0] : vector<8x64xf32> to vector<64xf32>
    %37 = vector.shape_cast %36 : vector<64xf32> to vector<1x64xf32>
    %cst_15 = arith.constant 8.000000e+00 : f32
    %38 = vector.broadcast %cst_15 : f32 to vector<1x64xf32>
    %39 = arith.divf %37, %38 : vector<1x64xf32>
    %40 = vector.broadcast %39 : vector<1x64xf32> to vector<8x64xf32>
    %41 = arith.subf %35, %40 : vector<8x64xf32>
    %42 = vector.broadcast %39 : vector<1x64xf32> to vector<8x64xf32>
    %43 = arith.subf %35, %42 : vector<8x64xf32>
    %44 = arith.mulf %41, %43 : vector<8x64xf32>
    %cst_16 = arith.constant dense<0.000000e+00> : vector<64xf32>
    %45 = vector.multi_reduction <add>, %44, %cst_16 [0] : vector<8x64xf32> to vector<64xf32>
    %46 = vector.shape_cast %45 : vector<64xf32> to vector<1x64xf32>
    %cst_17 = arith.constant 8.000000e+00 : f32
    %47 = vector.broadcast %cst_17 : f32 to vector<1x64xf32>
    %48 = arith.divf %46, %47 : vector<1x64xf32>
    %cst_18 = arith.constant 9.99999974E-6 : f32
    %49 = vector.broadcast %cst_18 : f32 to vector<1x64xf32>
    %50 = arith.addf %48, %49 : vector<1x64xf32>
    %51 = math.rsqrt %50 : vector<1x64xf32>
    %52 = arith.mulf %4, %51 : vector<1x64xf32>
    %53 = arith.mulf %39, %52 : vector<1x64xf32>
    %54 = arith.subf %5, %53 : vector<1x64xf32>
    %55 = vector.broadcast %52 : vector<1x64xf32> to vector<8x64xf32>
    %56 = arith.mulf %35, %55 : vector<8x64xf32>
    %57 = vector.broadcast %54 : vector<1x64xf32> to vector<8x64xf32>
    %58 = arith.addf %56, %57 : vector<8x64xf32>
    %cst_19 = arith.constant 0.000000e+00 : f32
    %59 = vector.broadcast %cst_19 : f32 to vector<8x64xf32>
    %60 = arith.maximumf %58, %59 : vector<8x64xf32>
    %c0_20 = arith.constant 0 : index
    %c0_21 = arith.constant 0 : index
    %61 = vector.load %arg3[%c0_20, %c0_21] : memref<64x128xf32, #tpu.memory_space<vmem>>, vector<64x128xf32>
    %cst_22 = arith.constant dense<0.000000e+00> : vector<8x128xf32>
    %62 = tpu.matmul %60, %61, %cst_22 {dimension_numbers = #tpu.dot_dimension_numbers<[1], [0], [0], [1], [0, 0, 1, 1], [], []>} : vector<8x64xf32>, vector<64x128xf32>, vector<8x128xf32> -> vector<8x128xf32>
    %63 = vector.broadcast %6 : vector<1x128xf32> to vector<8x128xf32>
    %64 = arith.addf %62, %63 : vector<8x128xf32>
    %c0_23 = arith.constant 0 : index
    %c0_24 = arith.constant 0 : index
    %65 = vector.load %arg5[%c0_23, %c0_24] : memref<8x128xf32, #tpu.memory_space<vmem>>, vector<8x128xf32>
    tpu.vector_store %arg5[%c0_23, %c0_24], %64 {strides = array<i32>} : memref<8x128xf32, #tpu.memory_space<vmem>>, vector<8x128xf32>,
    return
  }
}

</mosaic_0001>

<bundles_post_ra>
// kernel: tpu_custom_call.1
= control target key start
LH: loop header
LB: loop body
LE: loop exit
PB: predicated region body
PF: predicated region fallthrough
CT: control target
= control target key end

     0   :  { %v488_v1 = vmov 0.0   ;;  %vm489_vm0 = vmmov 0   ;;  %s665_s0 = inlined_call_operand.vmem [shape: f32[8,32], index: 0, kind: input, shape index: {}]   ;;  %s666_s1 = inlined_call_operand.vmem [shape: f32[32,128], index: 1, kind: input, shape index: {}]   ;;  %s667_s2 = inlined_call_operand.vmem [shape: f32[128,64], index: 2, kind: input, shape index: {}]   ;;  %s668_s3 = inlined_call_operand.vmem [shape: f32[64,128], index: 3, kind: input, shape index: {}]   ;;  %s669_s4 = inlined_call_operand.vmem [shape: f32[5,128], index: 4, kind: input, shape index: {}]   ;;  %s670_s5 = inlined_call_operand.hbm [shape: f32[8,128], index: 5, kind: output, shape index: {}]  }
   0x1   :  { %v26_v0 = vld [vmem:[%s666_s1 + $0x18] sm:$0xff]  ;;  %394 = vmatprep.subr.mxu0 %v488_v1  ;;  %v25_v2 = vld [vmem:[%s666_s1 + $0x10] sm:$0xff]  ;;  %402 = vmatprep.mubr.msk.f32.mxu0 %vm489_vm0, %v488_v1 }
   0x2   :  { %395 = vmatpush3.msra.mxu0 %v26_v0  ;;  %405 = vmatprep.subr.mxu1 %v488_v1 }
   0x3   :  { %10 = vsyncpa [#allocation3], 0  ;;  %396 = vmatprep.subr.mxu0 %v488_v1  ;;  %v24_v3 = vld [vmem:[%s666_s1 + $0x8] sm:$0xff]  ;;  %437 = vmatprep.mubr.msk.f32.mxu1 %vm489_vm0, %v488_v1  ;;  %v23_v4 = vld [vmem:[%s666_s1] sm:$0xff]  ;;  %vm27_vm1 = vcmask 261120   ;;  %v126_v41 = vlaneseq  ;;  %vm223_vm2 = vcmask 523264  }
   0x4   :  { %397 = vmatpush3.msra.mxu0 %v25_v2  ;;  %v21_v5 = vld [vmem:[%s665_s0] sm:$0xff]  ;;  %v152_v6 = vld [vmem:[%s667_s2 + $0x78] sm:$0xff]  ;;  %v151_v7 = vld [vmem:[%s667_s2 + $0x70] sm:$0xff] }
   0x5   :  { %398 = vmatprep.subr.mxu0 %v488_v1  ;;  %406 = vmatpush3.msra.mxu1 %v152_v6  ;;  %v150_v8 = vld [vmem:[%s667_s2 + $0x68] sm:$0xff]  ;;  %v149_v9 = vld [vmem:[%s667_s2 + $0x60] sm:$0xff]  ;;  %v148_v10 = vld [vmem:[%s667_s2 + $0x58] sm:$0xff]  ;;  %v611_v42 = vshrl.u32 %v126_v41, 7 }
   0x6   :  { %399 = vmatpush3.msra.mxu0 %v24_v3  ;;  %407 = vmatprep.subr.mxu1 %v488_v1  ;;  %v147_v11 = vld [vmem:[%s667_s2 + $0x50] sm:$0xff]  ;;  %v146_v12 = vld [vmem:[%s667_s2 + $0x48] sm:$0xff]  ;;  %v145_v13 = vld [vmem:[%s667_s2 + $0x40] sm:$0xff] }
   0x7   :  { %400 = vmatprep.subr.mxu0 %v488_v1  ;;  %408 = vmatpush3.msra.mxu1 %v151_v7  ;;  %v144_v14 = vld [vmem:[%s667_s2 + $0x38] sm:$0xff]  ;;  %v143_v15 = vld [vmem:[%s667_s2 + $0x30] sm:$0xff]  ;;  %v142_v16 = vld [vmem:[%s667_s2 + $0x28] sm:$0xff]  ;;  %v128_v46 = vsub.s32 0, %v611_v42  ;;  %v133_v50 = vsub.s32 1, %v611_v42 }
   0x8   :  { %401 = vmatpush3.msra.mxu0 %v23_v4  ;;  %409 = vmatprep.subr.mxu1 %v488_v1  ;;  %v141_v17 = vld [vmem:[%s667_s2 + $0x20] sm:$0xff]  ;;  %v140_v18 = vld [vmem:[%s667_s2 + $0x18] sm:$0xff]  ;;  %v139_v19 = vld [vmem:[%s667_s2 + $0x10] sm:$0xff] }
   0x9   :  { %403 = vmatmul.mubr.msk.f32.vlgmr.msra.gmra.mxu0 %vm27_vm1, %v21_v5  ;;  %440 = vmatprep.subr.mxu0 %v488_v1  ;;  %v138_v20 = vld [vmem:[%s667_s2 + $0x8] sm:$0xff]  ;;  %v137_v21 = vld [vmem:[%s667_s2] sm:$0xff]  ;;  %v268_v56 = vld [vmem:[%s668_s3 + $0x38] sm:$0xff] }
   0xa   :  { %456 = vmatprep.mubr.msk.f32.mxu0 %vm489_vm0, %v488_v1  ;;  %410 = vmatpush3.msra.mxu1 %v150_v8  ;;  %v616_v43 = vld [vmem:[%s669_s4] sm:$0x1f]  ;;  %v267_v57 = vld [vmem:[%s668_s3 + $0x30] sm:$0xff]  ;;  %v266_v58 = vld [vmem:[%s668_s3 + $0x28] sm:$0xff] }
   0xb   :  { %411 = vmatprep.subr.mxu1 %v488_v1  ;;  %441 = vmatpush3.msra.mxu0 %v268_v56  ;;  %v265_v59 = vld [vmem:[%s668_s3 + $0x20] sm:$0xff]  ;;  %v264_v60 = vld [vmem:[%s668_s3 + $0x18] sm:$0xff]  ;;  %v263_v61 = vld [vmem:[%s668_s3 + $0x10] sm:$0xff] }
   0xc   :  { %412 = vmatpush3.msra.mxu1 %v149_v9  ;;  %442 = vmatprep.subr.mxu0 %v488_v1  ;;  %v262_v62 = vld [vmem:[%s668_s3 + $0x8] sm:$0xff]  ;;  %v261_v63 = vld [vmem:[%s668_s3] sm:$0xff]  ;;  %s490_s3 = smov [#allocation2]  }
   0xd   :  { %413 = vmatprep.subr.mxu1 %v488_v1  ;;  %443 = vmatpush3.msra.mxu0 %v267_v57  ;;  %s353_s22 = sshll.u32 %s490_s3, 4  ;;  %s354_s22 = int_to_ptr.vmem [resolvable:$true] %s353_s22 }
   0xe   :  { %414 = vmatpush3.msra.mxu1 %v148_v10  ;;  %444 = vmatprep.subr.mxu0 %v488_v1  ;;  %s466_s23 = scalar_lea.vmem %s354_s22, 128  ;;  %p471_p1 = scmp.lt.s32.totalorder %s354_s22, %s354_s22 }
   0xf   :  { %415 = vmatprep.subr.mxu1 %v488_v1  ;;  %445 = vmatpush3.msra.mxu0 %v266_v58  ;;  %p467_p0 = scmp.ne.s32.totalorder %s354_s22, %s466_s23  ;;  %p472_p2 = scmp.lt.s32.totalorder %s466_s23, %s466_s23 }
  0x10   :  { %416 = vmatpush3.msra.mxu1 %v147_v11  ;;  %446 = vmatprep.subr.mxu0 %v488_v1 }
  0x11   :  { %417 = vmatprep.subr.mxu1 %v488_v1  ;;  %447 = vmatpush3.msra.mxu0 %v265_v59  ;;  %p473_p3 = por %p472_p2, %p471_p1 }
  0x12   :  { %418 = vmatpush3.msra.mxu1 %v146_v12  ;;  %448 = vmatprep.subr.mxu0 %v488_v1 }
  0x13   :  { %419 = vmatprep.subr.mxu1 %v488_v1  ;;  %449 = vmatpush3.msra.mxu0 %v264_v60  ;;  %p474_p4 = pnand %p473_p3, %p467_p0 }
  0x14   :  { %420 = vmatpush3.msra.mxu1 %v145_v13  ;;  %450 = vmatprep.subr.mxu0 %v488_v1 }
  0x15   :  { %421 = vmatprep.subr.mxu1 %v488_v1  ;;  %451 = vmatpush3.msra.mxu0 %v263_v61 }
  0x16   :  { %422 = vmatpush3.msra.mxu1 %v144_v14  ;;  %452 = vmatprep.subr.mxu0 %v488_v1 }
  0x17   :  { %423 = vmatprep.subr.mxu1 %v488_v1  ;;  %453 = vmatpush3.msra.mxu0 %v262_v62 }
  0x18   :  { %424 = vmatpush3.msra.mxu1 %v143_v15  ;;  %454 = vmatprep.subr.mxu0 %v488_v1 }
  0x19   :  { %425 = vmatprep.subr.mxu1 %v488_v1  ;;  %455 = vmatpush3.msra.mxu0 %v261_v63 }
  0x1a   :  { %426 = vmatpush3.msra.mxu1 %v142_v16 }
  0x1b   :  { %427 = vmatprep.subr.mxu1 %v488_v1 }
  0x1c   :  { %428 = vmatpush3.msra.mxu1 %v141_v17 }
  0x1d   :  { %429 = vmatprep.subr.mxu1 %v488_v1 }
  0x1e   :  { %430 = vmatpush3.msra.mxu1 %v140_v18 }
  0x1f   :  { %431 = vmatprep.subr.mxu1 %v488_v1 }
  0x20   :  { %432 = vmatpush3.msra.mxu1 %v139_v19 }
  0x21   :  { %433 = vmatprep.subr.mxu1 %v488_v1 }
  0x22   :  { %434 = vmatpush3.msra.mxu1 %v138_v20 }
  0x23   :  { %435 = vmatprep.subr.mxu1 %v488_v1 }
  0x24   :  { %436 = vmatpush3.msra.mxu1 %v137_v21 }
  0xc9   :  { %v97_v22 = vpop.f32.mrf.mxu0 }
  0xca   :  { %v101_v23 = vrot.slane %v97_v22, 4 }
  0xcb   :  { %v404_v24 = vpop.f32.mrf.mxu0 }
  0xcc   :  { %v102_v25 = vadd.f32 %v101_v23, %v97_v22  ;;  %v252_v23 = vsub.s32 2, %v611_v42 }
  0xce   :  { %v103_v26 = vrot.slane %v102_v25, 2 }
  0xd0   :  { %v104_v27 = vadd.f32 %v103_v26, %v102_v25 }
  0xd2   :  { %v105_v28 = vrot.slane %v104_v27, 1 }
  0xd4   :  { %v106_v29 = vadd.f32 %v105_v28, %v104_v27  ;;  %v257_v27 = vsub.s32 3, %v611_v42 }
  0xd6   :  { %v108_v30 = vmul.f32 0.125, %v106_v29 }
  0xd8   :  { %v109_v31 = vsub.f32 %v97_v22, %v108_v30 }
  0xda   :  { %v110_v32 = vmul.f32 %v109_v31, %v109_v31 }
  0xdc   :  { %v111_v33 = vrot.slane %v110_v32, 4 }
  0xde   :  { %v112_v34 = vadd.f32 %v111_v33, %v110_v32  ;;  %v271_v33 = vsub.s32 4, %v611_v42 }
  0xe0   :  { %v113_v35 = vrot.slane %v112_v34, 2 }
  0xe2   :  { %v114_v36 = vadd.f32 %v113_v35, %v112_v34  ;;  %v272_v34 = vrot.slane %v616_v43, %v271_v33 }
  0xe4   :  { %v115_v37 = vrot.slane %v114_v36, 1 }
  0xe6   :  { %v116_v38 = vadd.f32 %v115_v37, %v114_v36 }
  0xe8   :  { %v117_v39 = vmul.f32 0.125, %v116_v38 }
  0xea   :  { %v118_v40 = vadd.f32 1e-05, %v117_v39 }
  0xec   :  { %462 = vrsqrt.f32 %v118_v40 }
  0xf9   :  { %v463_v44 = vpop.eup %462 }
  0xfa   :  { %v120_v45 = vmul.f32 %v463_v44, %v616_v43 }
  0xfc   :  { %v121_v47 = vmul.f32 %v120_v45, %v108_v30  ;;  %v129_v49 = vrot.slane %v120_v45, %v128_v46 }
  0xfe   :  { %v123_v48 = vrot.slane %v121_v47, 7  ;;  %v130_v52 = vmul.f32 %v129_v49, %v97_v22 }
 0x100   :  { %v125_v51 = vsub.f32 %v616_v43, %v123_v48 }
 0x102   :  { %v134_v53 = vrot.slane %v125_v51, %v133_v50 }
 0x104   :  { %v135_v54 = vadd.f32 %v134_v53, %v130_v52 }
 0x106   :  { %v136_v55 = vmax.f32 %v135_v54, 0.0 }
 0x108   :  { %438 = vmatmul.mubr.f32.vlgmr.msra.gmra.mxu1 %v136_v55 }
 0x1c8   :  { %v219_v0 = vpop.f32.mrf.mxu1 }
 0x1c9   :  { %v224_v2 = vsel %vm223_vm2, %v219_v0, 0.0 }
 0x1ca   :  { %v225_v3 = vrot.slane %v224_v2, 4  ;;  %v439_v4 = vpop.f32.mrf.mxu1 }
 0x1cc   :  { %v226_v5 = vadd.f32 %v225_v3, %v224_v2 }
 0x1ce   :  { %v227_v6 = vrot.slane %v226_v5, 2 }
 0x1d0   :  { %v228_v7 = vadd.f32 %v227_v6, %v226_v5 }
 0x1d2   :  { %v229_v8 = vrot.slane %v228_v7, 1 }
 0x1d4   :  { %v230_v9 = vadd.f32 %v229_v8, %v228_v7 }
 0x1d6   :  { %v231_v10 = vmul.f32 0.125, %v230_v9 }
 0x1d8   :  { %v232_v11 = vsub.f32 %v219_v0, %v231_v10 }
 0x1da   :  { %v233_v12 = vmul.f32 %v232_v11, %v232_v11 }
 0x1dc   :  { %v234_v1 = vsel %vm223_vm2, %v233_v12, 0.0 }
 0x1dd   :  { %v235_v13 = vrot.slane %v234_v1, 4 }
 0x1df   :  { %v236_v14 = vadd.f32 %v235_v13, %v234_v1 }
 0x1e1   :  { %v237_v15 = vrot.slane %v236_v14, 2 }
 0x1e3   :  { %v238_v16 = vadd.f32 %v237_v15, %v236_v14 }
 0x1e5   :  { %v239_v17 = vrot.slane %v238_v16, 1 }
 0x1e7   :  { %v240_v18 = vadd.f32 %v239_v17, %v238_v16 }
 0x1e9   :  { %v241_v19 = vmul.f32 0.125, %v240_v18 }
 0x1eb   :  { %v242_v20 = vadd.f32 1e-05, %v241_v19 }
 0x1ed   :  { %464 = vrsqrt.f32 %v242_v20 }
 0x1fa   :  { %v465_v21 = vpop.eup %464 }
 0x1fb   :  { %v244_v22 = vmul.f32 %v465_v21, %v616_v43 }
 0x1fd   :  { %v245_v24 = vmul.f32 %v244_v22, %v231_v10  ;;  %v253_v26 = vrot.slane %v244_v22, %v252_v23 }
 0x1ff   :  { %v247_v25 = vrot.slane %v245_v24, 7  ;;  %v254_v29 = vmul.f32 %v253_v26, %v219_v0 }
 0x201   :  { %v249_v28 = vsub.f32 %v616_v43, %v247_v25 }
 0x203   :  { %v258_v30 = vrot.slane %v249_v28, %v257_v27 }
 0x205   :  { %v259_v31 = vadd.f32 %v258_v30, %v254_v29 }
 0x207   :  { %v260_v32 = vmax.f32 %v259_v31, 0.0 }
 0x209   :  { %457 = vmatmul.mubr.msk.f32.vlgmr.msra.gmra.mxu0 %vm223_vm2, %v260_v32 }
 0x2c9   :  { %v342_v35 = vpop.f32.mrf.mxu0 }
 0x2ca   :  { %v343_v36 = vadd.f32 %v342_v35, %v272_v34 }
 0x2cb   :  { %v458_v37 = vpop.f32.mrf.mxu0 }
 0x2cc   :  { %346 = vst [vmem:[#allocation2] sm:$0xff] %v343_v36 }
 0x2cd   :  { %477 = shalt.err (!%p474_p4)
}
 0x2ce   :  { %356 = dma.vmem_to_hbm [thread:$0]  %s354_s22, 128, %s670_s5, [#allocation3]  }
 0x2cf   :  { %486 = dma.done.wait [#allocation3], 128  }
 0x2d0   :  { %487 = vsyncadd [#allocation3], 4294967168 }
 0x2d1   :  { %360 = vsyncpa [#allocation3], 1 }

</bundles_post_ra>
